<compile_context>
chip_gen: v7x
topology: tpu7x:2x2x1
jax: 0.10.0
libtpu: 0.0.40
codegen_flags: <defaults>
</compile_context>

<pallas_src>
import functools

import jax
import jax.numpy as jnp
from jax.experimental import pallas as pl
from jax.experimental.pallas import tpu as pltpu


def _round_up(n, m):
    return ((n + m - 1) // m) * m


def _is_two_core_chip():
    """True on chips with 2 TensorCores per chip (v7x); False on v5e/v6e/unknown."""
    try:
        kind = jax.devices()[0].device_kind.lower()
    except Exception:  # pragma: no cover - defensive
        return False
    return "v7" in kind


_TWO_CORE = _is_two_core_chip()


def _dqn_kernel(x_ref, w1_ref, b1_ref, w2_ref, b2_ref, w3_ref, b3_ref, o_ref):
    """Fused 3-layer MLP (Linear->ReLU->Linear->ReLU->Linear) on one batch tile."""
    x = x_ref[...]

    h1 = jnp.dot(x, w1_ref[...], preferred_element_type=jnp.float32) + b1_ref[...]
    h1 = jnp.maximum(h1, 0.0)

    h2 = jnp.dot(h1, w2_ref[...], preferred_element_type=jnp.float32) + b2_ref[...]
    h2 = jnp.maximum(h2, 0.0)

    out = jnp.dot(h2, w3_ref[...], preferred_element_type=jnp.float32) + b3_ref[...]
    o_ref[...] = out.astype(o_ref.dtype)


def pad_dqn_params(params):
    """Pad ONLY the final output feature dim to a multiple of 128 (lane-dense store).

    Layout (same as init_dqn_params): W is (in_features, out_features), b is
    (1, out_features), i.e. y = x @ W + b.  W1/W2/b1/b2 are left unpadded —
    their block shapes use full array extents, which is legal.
    """
    w1, b1, w2, b2, w3, b3 = params
    h2_dim, out_dim = w3.shape
    out_p = _round_up(out_dim, 128)

    f32 = jnp.float32
    w3p = jnp.zeros((h2_dim, out_p), f32).at[:, :out_dim].set(w3.astype(f32))
    b3p = jnp.zeros((1, out_p), f32).at[:, :out_dim].set(b3.astype(f32))
    return (w1.astype(f32), b1.astype(f32), w2.astype(f32), b2.astype(f32), w3p, b3p)


@functools.partial(jax.jit, static_argnames=("out_dim",))
def dqn_forward(x, padded_params, out_dim):
    """Run the fused DQN MLP.

    x: (B, input_dim) float32.  padded_params from pad_dqn_params().
    """
    w1, b1, w2, b2, w3p, b3p = padded_params
    B, in_dim = x.shape
    h1_dim = w1.shape[1]   # 128
    h2_dim = w2.shape[1]   # 64
    out_p = w3p.shape[1]   # out_dim rounded up to 128

    # Batch tile selection (trace-time / static):
    #  * single-TC chips (v5e/v6e) or small batches -> one grid step, no split.
    #  * v7x with a large batch -> 2 parallel tiles, one per TensorCore.
    if _TWO_CORE and B >= 512:
        blk = _round_up(-(-B // 2), 8)
    else:
        blk = _round_up(B, 8)
    blk = max(8, blk)
    b_pad = _round_up(B, blk)
    grid = (b_pad // blk,)

    xp = x.astype(jnp.float32)
    if b_pad != B:
        # Only needed when B is not a multiple of 8 (rare for DQN minibatches);
        # pads batch rows only, never the feature axis.
        xp = jnp.pad(xp, ((0, b_pad - B), (0, 0)))

    # Advisory cost estimate so XLA can overlap this call with surrounding ops.
    flops = 2 * b_pad * (in_dim * h1_dim + h1_dim * h2_dim + h2_dim * out_p)
    bytes_accessed = 4 * (
        b_pad * in_dim                                   # x
        + in_dim * h1_dim + h1_dim * h2_dim + h2_dim * out_p  # weights
        + h1_dim + h2_dim + out_p                        # biases
        + b_pad * out_p                                  # output
    )

    in_specs = [
        pl.BlockSpec((blk, in_dim), lambda i: (i, 0)),      # x tile (full feature dim)
        pl.BlockSpec((in_dim, h1_dim), lambda i: (0, 0)),   # W1 (VMEM-resident)
        pl.BlockSpec((1, h1_dim), lambda i: (0, 0)),        # b1
        pl.BlockSpec((h1_dim, h2_dim), lambda i: (0, 0)),   # W2 (unpadded 128x64)
        pl.BlockSpec((1, h2_dim), lambda i: (0, 0)),        # b2
        pl.BlockSpec((h2_dim, out_p), lambda i: (0, 0)),    # W3 (out dim padded to 128)
        pl.BlockSpec((1, out_p), lambda i: (0, 0)),         # b3
    ]
    # Lane-dense output block (out_p multiple of 128) -> unmasked stores.
    out_specs = pl.BlockSpec((blk, out_p), lambda i: (i, 0))

    out_padded = pl.pallas_call(
        _dqn_kernel,
        out_shape=jax.ShapeDtypeStruct((b_pad, out_p), jnp.float32),
        grid=grid,
        in_specs=in_specs,
        out_specs=out_specs,
        compiler_params=pltpu.CompilerParams(
            dimension_semantics=("parallel",),
        ),
        cost_estimate=pl.CostEstimate(
            flops=flops, transcendentals=0, bytes_accessed=bytes_accessed
        ),
    )(xp, w1, b1, w2, b2, w3p, b3p)

    if b_pad != B:
        return out_padded[:B, :out_dim]
    return out_padded[:, :out_dim]   # pure lane slice, no batch slice


def init_dqn_params(key, input_dim, output_dim):
    """Deterministic init mimicking PyTorch nn.Linear default (uniform +-1/sqrt(fan_in))."""
    dims = [(input_dim, 128), (128, 64), (64, output_dim)]
    params = []
    for (fan_in, fan_out) in dims:
        key, kw, kb = jax.random.split(key, 3)
        bound = 1.0 / jnp.sqrt(fan_in)
        w = jax.random.uniform(kw, (fan_in, fan_out), jnp.float32, -bound, bound)
        b = jax.random.uniform(kb, (1, fan_out), jnp.float32, -bound, bound)
        params.extend([w, b])
    return tuple(params)


def dqn_reference(x, params):
    """Plain-JAX reference for correctness check (HIGHEST precision to avoid
    bf16-pass matmul flakiness on TPU)."""
    w1, b1, w2, b2, w3, b3 = params
    hi = jax.lax.Precision.HIGHEST
    h1 = jnp.maximum(jnp.dot(x, w1, precision=hi) + b1, 0.0)
    h2 = jnp.maximum(jnp.dot(h1, w2, precision=hi) + b2, 0.0)
    return jnp.dot(h2, w3, precision=hi) + b3


if __name__ == "__main__":
    key = jax.random.PRNGKey(0)
    kx, kp = jax.random.split(key)

    batch = 32       # small DQN replay-minibatch (multiple of 8 -> no batch pad)
    input_dim = 16   # environment observation vector size
    output_dim = 4   # number of discrete actions

    x = jax.random.normal(kx, (batch, input_dim), jnp.float32)
    params = init_dqn_params(kp, input_dim, output_dim)
    padded_params = pad_dqn_params(params)

    out = dqn_forward(x, padded_params, out_dim=output_dim)
    out = jax.block_until_ready(out)

    ref = dqn_reference(x, params)
    assert out.shape == (batch, output_dim)
    assert jnp.allclose(out, ref, atol=1e-4, rtol=1e-4), "mismatch vs reference"

    # Also exercise the non-multiple-of-8 batch path once (pads 3 rows only).
    x_odd = jax.random.normal(kx, (29, input_dim), jnp.float32)
    out_odd = jax.block_until_ready(dqn_forward(x_odd, padded_params, out_dim=output_dim))
    assert out_odd.shape == (29, output_dim)
    assert jnp.allclose(out_odd, dqn_reference(x_odd, params), atol=1e-4, rtol=1e-4)

    # TODO(synk): optionally fuse a max/argmax-over-actions epilogue into the kernel
    # for the target-Q path to avoid storing the 128-padded Q slab at all.

    print("KERNEL_OK")
</pallas_src>

<mosaic_0001>
module attributes {stable_mosaic.version = 11 : i64} {
  func.func @_dqn_kernel(%arg0: i32, %arg1: memref<32x16xf32, #tpu.memory_space<vmem>>, %arg2: memref<16x128xf32, #tpu.memory_space<vmem>>, %arg3: memref<1x128xf32, #tpu.memory_space<vmem>>, %arg4: memref<128x64xf32, #tpu.memory_space<vmem>>, %arg5: memref<1x64xf32, #tpu.memory_space<vmem>>, %arg6: memref<64x128xf32, #tpu.memory_space<vmem>>, %arg7: memref<1x128xf32, #tpu.memory_space<vmem>>, %arg8: memref<32x128xf32, #tpu.memory_space<vmem>>) attributes {dimension_semantics = [#tpu.dimension_semantics<parallel>], iteration_bounds = array<i64: 1>, scalar_prefetch = 0 : i64, scratch_operands = 0 : i64, tpu.core_type = #tpu.core_type<tc>, window_params = [{transform_indices = @transform_0, window_bounds = array<i64: 32, 16>}, {pipeline_mode = #tpu.pipeline_mode<synchronous>, transform_indices = @transform_1, window_bounds = array<i64: 16, 128>}, {pipeline_mode = #tpu.pipeline_mode<synchronous>, transform_indices = @transform_2, window_bounds = array<i64: 1, 128>}, {pipeline_mode = #tpu.pipeline_mode<synchronous>, transform_indices = @transform_3, window_bounds = array<i64: 128, 64>}, {pipeline_mode = #tpu.pipeline_mode<synchronous>, transform_indices = @transform_4, window_bounds = array<i64: 1, 64>}, {pipeline_mode = #tpu.pipeline_mode<synchronous>, transform_indices = @transform_5, window_bounds = array<i64: 64, 128>}, {pipeline_mode = #tpu.pipeline_mode<synchronous>, transform_indices = @transform_6, window_bounds = array<i64: 1, 128>}, {transform_indices = @transform_7, window_bounds = array<i64: 32, 128>}]} {
    %c0 = arith.constant 0 : index
    %c0_0 = arith.constant 0 : index
    %0 = vector.load %arg1[%c0, %c0_0] : memref<32x16xf32, #tpu.memory_space<vmem>>, vector<32x16xf32>
    %c0_1 = arith.constant 0 : index
    %c0_2 = arith.constant 0 : index
    %1 = vector.load %arg2[%c0_1, %c0_2] : memref<16x128xf32, #tpu.memory_space<vmem>>, vector<16x128xf32>
    %cst = arith.constant dense<0.000000e+00> : vector<32x128xf32>
    %2 = tpu.matmul %0, %1, %cst {dimension_numbers = #tpu.dot_dimension_numbers<[1], [0], [0], [1], [0, 0, 1, 1], [], []>} : vector<32x16xf32>, vector<16x128xf32>, vector<32x128xf32> -> vector<32x128xf32>
    %c0_3 = arith.constant 0 : index
    %c0_4 = arith.constant 0 : index
    %3 = vector.load %arg3[%c0_3, %c0_4] : memref<1x128xf32, #tpu.memory_space<vmem>>, vector<1x128xf32>
    %4 = vector.broadcast %3 : vector<1x128xf32> to vector<32x128xf32>
    %5 = arith.addf %2, %4 : vector<32x128xf32>
    %cst_5 = arith.constant 0.000000e+00 : f32
    %6 = vector.broadcast %cst_5 : f32 to vector<32x128xf32>
    %7 = arith.maximumf %5, %6 : vector<32x128xf32>
    %c0_6 = arith.constant 0 : index
    %c0_7 = arith.constant 0 : index
    %8 = vector.load %arg4[%c0_6, %c0_7] : memref<128x64xf32, #tpu.memory_space<vmem>>, vector<128x64xf32>
    %cst_8 = arith.constant dense<0.000000e+00> : vector<32x64xf32>
    %9 = tpu.matmul %7, %8, %cst_8 {dimension_numbers = #tpu.dot_dimension_numbers<[1], [0], [0], [1], [0, 0, 1, 1], [], []>} : vector<32x128xf32>, vector<128x64xf32>, vector<32x64xf32> -> vector<32x64xf32>
    %c0_9 = arith.constant 0 : index
    %c0_10 = arith.constant 0 : index
    %10 = vector.load %arg5[%c0_9, %c0_10] : memref<1x64xf32, #tpu.memory_space<vmem>>, vector<1x64xf32>
    %11 = vector.broadcast %10 : vector<1x64xf32> to vector<32x64xf32>
    %12 = arith.addf %9, %11 : vector<32x64xf32>
    %cst_11 = arith.constant 0.000000e+00 : f32
    %13 = vector.broadcast %cst_11 : f32 to vector<32x64xf32>
    %14 = arith.maximumf %12, %13 : vector<32x64xf32>
    %c0_12 = arith.constant 0 : index
    %c0_13 = arith.constant 0 : index
    %15 = vector.load %arg6[%c0_12, %c0_13] : memref<64x128xf32, #tpu.memory_space<vmem>>, vector<64x128xf32>
    %cst_14 = arith.constant dense<0.000000e+00> : vector<32x128xf32>
    %16 = tpu.matmul %14, %15, %cst_14 {dimension_numbers = #tpu.dot_dimension_numbers<[1], [0], [0], [1], [0, 0, 1, 1], [], []>} : vector<32x64xf32>, vector<64x128xf32>, vector<32x128xf32> -> vector<32x128xf32>
    %c0_15 = arith.constant 0 : index
    %c0_16 = arith.constant 0 : index
    %17 = vector.load %arg7[%c0_15, %c0_16] : memref<1x128xf32, #tpu.memory_space<vmem>>, vector<1x128xf32>
    %18 = vector.broadcast %17 : vector<1x128xf32> to vector<32x128xf32>
    %19 = arith.addf %16, %18 : vector<32x128xf32>
    %c0_17 = arith.constant 0 : index
    %c0_18 = arith.constant 0 : index
    %20 = vector.load %arg8[%c0_17, %c0_18] : memref<32x128xf32, #tpu.memory_space<vmem>>, vector<32x128xf32>
    tpu.vector_store %arg8[%c0_17, %c0_18], %19 {strides = array<i32>} : memref<32x128xf32, #tpu.memory_space<vmem>>, vector<32x128xf32>,
    return
  }
  func.func @transform_0(%arg0: i32) -> (i32, i32) {
    %c0_i32 = arith.constant 0 : i32
    %c0_i32_0 = arith.constant 0 : i32
    return %arg0, %c0_i32 : i32, i32
  }
  func.func @transform_1(%arg0: i32) -> (i32, i32) {
    %c0_i32 = arith.constant 0 : i32
    %c0_i32_0 = arith.constant 0 : i32
    %c0_i32_1 = arith.constant 0 : i32
    return %c0_i32, %c0_i32_0 : i32, i32
  }
  func.func @transform_2(%arg0: i32) -> (i32, i32) {
    %c0_i32 = arith.constant 0 : i32
    %c0_i32_0 = arith.constant 0 : i32
    %c0_i32_1 = arith.constant 0 : i32
    return %c0_i32, %c0_i32_0 : i32, i32
  }
  func.func @transform_3(%arg0: i32) -> (i32, i32) {
    %c0_i32 = arith.constant 0 : i32
    %c0_i32_0 = arith.constant 0 : i32
    %c0_i32_1 = arith.constant 0 : i32
    return %c0_i32, %c0_i32_0 : i32, i32
  }
  func.func @transform_4(%arg0: i32) -> (i32, i32) {
    %c0_i32 = arith.constant 0 : i32
    %c0_i32_0 = arith.constant 0 : i32
    %c0_i32_1 = arith.constant 0 : i32
    return %c0_i32, %c0_i32_0 : i32, i32
  }
  func.func @transform_5(%arg0: i32) -> (i32, i32) {
    %c0_i32 = arith.constant 0 : i32
    %c0_i32_0 = arith.constant 0 : i32
    %c0_i32_1 = arith.constant 0 : i32
    return %c0_i32, %c0_i32_0 : i32, i32
  }
  func.func @transform_6(%arg0: i32) -> (i32, i32) {
    %c0_i32 = arith.constant 0 : i32
    %c0_i32_0 = arith.constant 0 : i32
    %c0_i32_1 = arith.constant 0 : i32
    return %c0_i32, %c0_i32_0 : i32, i32
  }
  func.func @transform_7(%arg0: i32) -> (i32, i32) {
    %c0_i32 = arith.constant 0 : i32
    %c0_i32_0 = arith.constant 0 : i32
    return %arg0, %c0_i32 : i32, i32
  }
}

</mosaic_0001>

<bundles_post_ra>
// kernel: dqn_forward.1
= control target key start
LH: loop header
LB: loop body
LE: loop exit
PB: predicated region body
PF: predicated region fallthrough
CT: control target
= control target key end

     0   :  { %vm39_vm0 = vcmask 130048   ;;  %vm268_vm1 = vcmask 523264   ;;  %s700_s1 = inlined_call_operand.vmem [shape: f32[16,128], index: 1, kind: input, shape index: {}]   ;;  %s701_s0 = inlined_call_operand.vmem [shape: f32[32,16], index: 0, kind: input, shape index: {}]   ;;  %s702_s3 = inlined_call_operand.vmem [shape: f32[128,64], index: 3, kind: input, shape index: {}]   ;;  %s703_s5 = inlined_call_operand.vmem [shape: f32[64,128], index: 5, kind: input, shape index: {}]   ;;  %s704_s2 = inlined_call_operand.vmem [shape: f32[1,128], index: 2, kind: input, shape index: {}]   ;;  %s705_s4 = inlined_call_operand.vmem [shape: f32[1,64], index: 4, kind: input, shape index: {}]   ;;  %s706_s6 = inlined_call_operand.vmem [shape: f32[1,128], index: 6, kind: input, shape index: {}]   ;;  %s707_s7 = inlined_call_operand.vmem [shape: f32[32,128], index: 7, kind: output, shape index: {}]  }
   0x1   :  { %v30_v0 = vld [vmem:[%s700_s1] sm:$0xff]  ;;  %v31_v1 = vld [vmem:[%s700_s1 + $0x8] sm:$0xff]  ;;  %v143_v6 = vld [vmem:[%s702_s3 + $0x10] sm:$0xff] }
   0x2   :  { %v26_v2 = vld [vmem:[%s701_s0] sm:$0xff]  ;;  %v493_v3 = vpack.c.bf16 %v31_v1, %v30_v0  ;;  %v142_v5 = vld [vmem:[%s702_s3 + $0x8] sm:$0xff]  ;;  %v144_v8 = vld [vmem:[%s702_s3 + $0x18] sm:$0xff] }
   0x3   :  { %427 = vmatprep.mubr.msk.f32.mxu0 %vm39_vm0, %v26_v2  ;;  %v141_v4 = vld [vmem:[%s702_s3] sm:$0xff]  ;;  %v27_v9 = vld [vmem:[%s701_s0 + $0x8] sm:$0xff]  ;;  %v501_v10 = vpack.c.bf16 %v144_v8, %v143_v6  ;;  %v28_v13 = vld [vmem:[%s701_s0 + $0x10] sm:$0xff] }
   0x4   :  { %494 = vmatprep.subr.bf16.mxu0 %v493_v3  ;;  %v497_v7 = vpack.c.bf16 %v142_v5, %v141_v4  ;;  %v145_v11 = vld [vmem:[%s702_s3 + $0x20] sm:$0xff]  ;;  %v146_v12 = vld [vmem:[%s702_s3 + $0x28] sm:$0xff]  ;;  %v29_v15 = vld [vmem:[%s701_s0 + $0x18] sm:$0xff] }
   0x5   :  { %496 = vmatpush3.bf16.msra.mxu0 %v493_v3  ;;  %v505_v14 = vpack.c.bf16 %v146_v12, %v145_v11  ;;  %v147_v16 = vld [vmem:[%s702_s3 + $0x30] sm:$0xff]  ;;  %v148_v17 = vld [vmem:[%s702_s3 + $0x38] sm:$0xff]  ;;  %v149_v19 = vld [vmem:[%s702_s3 + $0x40] sm:$0xff] }
   0x6   :  { %498 = vmatprep.subr.bf16.mxu1 %v497_v7  ;;  %v509_v18 = vpack.c.bf16 %v148_v17, %v147_v16  ;;  %v150_v20 = vld [vmem:[%s702_s3 + $0x48] sm:$0xff]  ;;  %v151_v22 = vld [vmem:[%s702_s3 + $0x50] sm:$0xff]  ;;  %v152_v23 = vld [vmem:[%s702_s3 + $0x58] sm:$0xff] }
   0x7   :  { %500 = vmatpush3.bf16.msra.mxu1 %v497_v7  ;;  %v513_v21 = vpack.c.bf16 %v150_v20, %v149_v19  ;;  %v517_v24 = vpack.c.bf16 %v152_v23, %v151_v22  ;;  %v153_v25 = vld [vmem:[%s702_s3 + $0x60] sm:$0xff]  ;;  %v154_v26 = vld [vmem:[%s702_s3 + $0x68] sm:$0xff]  ;;  %v155_v28 = vld [vmem:[%s702_s3 + $0x70] sm:$0xff] }
   0x8   :  { %428 = vmatmul.mubr.msk.f32.vlgmr.msra.gmra.mrb[0].mxu0 %vm39_vm0, %v27_v9  ;;  %502 = vmatprep.subr.bf16.mxu1 %v501_v10  ;;  %v521_v27 = vpack.c.bf16 %v154_v26, %v153_v25  ;;  %v156_v29 = vld [vmem:[%s702_s3 + $0x78] sm:$0xff]  ;;  %v253_v31 = vld [vmem:[%s703_s5] sm:$0xff]  ;;  %v254_v32 = vld [vmem:[%s703_s5 + $0x8] sm:$0xff] }
   0x9   :  { %430 = vmatprep.mubr.msk.f32.mxu0 %vm39_vm0, %v28_v13  ;;  %v525_v30 = vpack.c.bf16 %v156_v29, %v155_v28  ;;  %v255_v33 = vld [vmem:[%s703_s5 + $0x10] sm:$0xff]  ;;  %v529_v34 = vpack.c.bf16 %v254_v32, %v253_v31  ;;  %v256_v35 = vld [vmem:[%s703_s5 + $0x18] sm:$0xff]  ;;  %v257_v37 = vld [vmem:[%s703_s5 + $0x20] sm:$0xff] }
   0xa   :  { %v533_v36 = vpack.c.bf16 %v256_v35, %v255_v33  ;;  %v258_v38 = vld [vmem:[%s703_s5 + $0x28] sm:$0xff]  ;;  %v374_v40 = vld [vmem:[%s704_s2] ss:$0 sm:$0xff]  ;;  %v259_v53 = vld [vmem:[%s703_s5 + $0x30] sm:$0xff] }
   0xb   :  { %504 = vmatpush3.bf16.msra.mxu1 %v501_v10  ;;  %530 = vmatprep.subr.bf16.mxu0 %v529_v34  ;;  %v537_v39 = vpack.c.bf16 %v258_v38, %v257_v37  ;;  %v260_v54 = vld [vmem:[%s703_s5 + $0x38] sm:$0xff]  ;;  %v379_v56 = vld [vmem:[%s705_s4] ss:$0 sm:$0xff] }
   0xc   :  { %431 = vmatmul.mubr.msk.f32.gmra.mrb[2].mxu0 %vm39_vm0, %v29_v15  ;;  %506 = vmatprep.subr.bf16.mxu1 %v505_v14  ;;  %v541_v55 = vpack.c.bf16 %v260_v54, %v259_v53  ;;  %v380_v5 = vld [vmem:[%s706_s6] ss:$0 sm:$0xff] }
   0xd   :  { %532 = vmatpush3.bf16.msra.mxu0 %v529_v34 }
   0xe   :  { %534 = vmatprep.subr.bf16.mxu0 %v533_v36 }
   0xf   :  { %508 = vmatpush3.bf16.msra.mxu1 %v505_v14 }
  0x10   :  { %510 = vmatprep.subr.bf16.mxu1 %v509_v18 }
  0x11   :  { %536 = vmatpush3.bf16.msra.mxu0 %v533_v36 }
  0x12   :  { %538 = vmatprep.subr.bf16.mxu0 %v537_v39 }
  0x13   :  { %512 = vmatpush3.bf16.msra.mxu1 %v509_v18 }
  0x14   :  { %514 = vmatprep.subr.bf16.mxu1 %v513_v21 }
  0x15   :  { %540 = vmatpush3.bf16.msra.mxu0 %v537_v39 }
  0x16   :  { %542 = vmatprep.subr.bf16.mxu0 %v541_v55 }
  0x17   :  { %516 = vmatpush3.bf16.msra.mxu1 %v513_v21 }
  0x18   :  { %518 = vmatprep.subr.bf16.mxu1 %v517_v24 }
  0x19   :  { %544 = vmatpush3.bf16.msra.mxu0 %v541_v55 }
  0x1b   :  { %520 = vmatpush3.bf16.msra.mxu1 %v517_v24 }
  0x1c   :  { %522 = vmatprep.subr.bf16.mxu1 %v521_v27 }
  0x1f   :  { %524 = vmatpush3.bf16.msra.mxu1 %v521_v27 }
  0x20   :  { %526 = vmatprep.subr.bf16.mxu1 %v525_v30 }
  0x23   :  { %528 = vmatpush3.bf16.msra.mxu1 %v525_v30 }
  0xdb   :  { %v429_v41 = vpop.f32.mrb[0].mxu0 }
  0xdc   :  { %v124_v42 = vadd.f32 %v429_v41, %v374_v40  ;;  %v118_v43 = vpop.f32.mrb[1].mxu0 }
  0xdd   :  { %v119_v44 = vadd.f32 %v374_v40, %v118_v43 }
  0xde   :  { %v138_v47 = vmax.f32 %v124_v42, 0.0 }
  0xdf   :  { %v432_v45 = vpop.f32.mrb[2].mxu0  ;;  %v137_v46 = vmax.f32 %v119_v44, 0.0 }
  0xe0   :  { %v134_v48 = vadd.f32 %v432_v45, %v374_v40  ;;  %v128_v49 = vpop.f32.mrb[3].mxu0 }
  0xe1   :  { %v129_v50 = vadd.f32 %v374_v40, %v128_v49  ;;  %465 = vmatprep.mubr.f32.mxu1 %v137_v46 }
  0xe2   :  { %466 = vmatmul.mubr.f32.vlgmr.msra.gmra.mrb[0].mxu1 %v138_v47  ;;  %v140_v52 = vmax.f32 %v134_v48, 0.0 }
  0xe3   :  { %v139_v51 = vmax.f32 %v129_v50, 0.0 }
  0xe5   :  { %468 = vmatprep.mubr.f32.mxu1 %v139_v51 }
  0xe6   :  { %469 = vmatmul.mubr.f32.gmra.mrb[2].mxu1 %v140_v52 }
 0x1b5   :  { %v467_v57 = vpop.f32.mrb[0].mxu1 }
 0x1b6   :  { %v236_v58 = vadd.f32 %v467_v57, %v379_v56  ;;  %v230_v59 = vpop.f32.mrb[1].mxu1 }
 0x1b7   :  { %v231_v60 = vadd.f32 %v379_v56, %v230_v59 }
 0x1b8   :  { %v250_v63 = vmax.f32 %v236_v58, 0.0 }
 0x1b9   :  { %v249_v61 = vmax.f32 %v231_v60, 0.0  ;;  %v470_v62 = vpop.f32.mrb[2].mxu1 }
 0x1ba   :  { %v246_v0 = vadd.f32 %v470_v62, %v379_v56  ;;  %v240_v1 = vpop.f32.mrb[3].mxu1 }
 0x1bb   :  { %v241_v2 = vadd.f32 %v379_v56, %v240_v1  ;;  %487 = vmatprep.mubr.msk.f32.mxu0 %vm268_vm1, %v249_v61 }
 0x1bc   :  { %488 = vmatmul.mubr.msk.f32.vlgmr.msra.gmra.mrb[4].mxu0 %vm268_vm1, %v250_v63  ;;  %v252_v4 = vmax.f32 %v246_v0, 0.0 }
 0x1bd   :  { %v251_v3 = vmax.f32 %v241_v2, 0.0 }
 0x1bf   :  { %490 = vmatprep.mubr.msk.f32.mxu0 %vm268_vm1, %v251_v3 }
 0x1c0   :  { %491 = vmatmul.mubr.msk.f32.gmra.mrb[6].mxu0 %vm268_vm1, %v252_v4 }
 0x28f   :  { %v489_v6 = vpop.f32.mrb[4].mxu0 }
 0x290   :  { %v353_v7 = vadd.f32 %v489_v6, %v380_v5  ;;  %v347_v8 = vpop.f32.mrb[5].mxu0 }
 0x291   :  { %v348_v9 = vadd.f32 %v380_v5, %v347_v8 }
 0x292   :  { %367 = vst [vmem:[%s707_s7 + $0x8] sm:$0xff] %v353_v7 }
 0x293   :  { %366 = vst [vmem:[%s707_s7] sm:$0xff] %v348_v9  ;;  %v492_v10 = vpop.f32.mrb[6].mxu0 }
 0x294   :  { %v363_v11 = vadd.f32 %v492_v10, %v380_v5  ;;  %v357_v12 = vpop.f32.mrb[7].mxu0 }
 0x295   :  { %v358_v13 = vadd.f32 %v380_v5, %v357_v12 }
 0x296   :  { %369 = vst [vmem:[%s707_s7 + $0x18] sm:$0xff] %v363_v11 }
 0x297   :  { %368 = vst [vmem:[%s707_s7 + $0x10] sm:$0xff] %v358_v13 }

</bundles_post_ra>
